<compile_context>
chip_gen: v6e
topology: v6e:2x2x1
jax: 0.10.0
libtpu: 0.0.40
codegen_flags: <defaults>
</compile_context>

<pallas_src>
import functools

import jax
import jax.numpy as jnp
from jax.experimental import pallas as pl
from jax.experimental.pallas import tpu as pltpu


GAMMA = 1.0      # unused by forward() (GAE path only)
LMBDA = 0.975    # unused by forward() (GAE path only)
EPSILON = 0.2
C2 = 0.1


def _round_up(x, m):
    return (x + m - 1) // m * m


def _ppo_loss_kernel(nlp_ref, side_ref, out_ref, acc_ref, *, epsilon, c2, inv_n):
    i = pl.program_id(0)

    @pl.when(i == 0)
    def _init():
        acc_ref[0] = jnp.float32(0.0)
        acc_ref[1] = jnp.float32(0.0)
        acc_ref[2] = jnp.float32(0.0)

    nlp = nlp_ref[...].astype(jnp.float32)      # (TN, A) upcast in-kernel
    _, a = nlp.shape
    side = side_ref[...].astype(jnp.float32)    # (TN, 8) packed per-sample data

    act = side[:, 0:1].astype(jnp.int32)        # action index
    ref_lp = side[:, 1:2]                       # ref_log_probs
    adv = side[:, 2:3]                          # advantages
    v_tgt = side[:, 3:4]                        # V (target)
    vals = side[:, 4:5]                         # values
    valid = side[:, 5:6]                        # 1.0 for real rows, 0.0 for pad

    # one-hot gather of new_log_probs[row, action] without a (TN, A) int tile
    col_ids = jax.lax.broadcasted_iota(jnp.int32, (1, a), 1)     # (1, A)
    chosen = jnp.sum(jnp.where(col_ids == act, nlp, 0.0),
                     axis=-1, keepdims=True)                     # (TN, 1)

    # clipped surrogate (asymmetric lb/ub exactly as in the module)
    ratio = jnp.exp(chosen - ref_lp)
    lb = jnp.where(adv < 0, 1.0 - epsilon, 0.0)
    ub = jnp.where(adv > 0, 1.0 + epsilon, 10000.0)
    surrogate = jnp.minimum(ratio * adv, jnp.clip(ratio, lb, ub) * adv)  # (TN,1)

    # critic: |values - V| ;  entropy: sum_a exp(lp) * lp per row
    l1 = jnp.abs(vals - v_tgt)                                           # (TN,1)
    ent_rows = jnp.sum(jnp.exp(nlp) * nlp, axis=-1, keepdims=True)       # (TN,1)

    # masked raw partial sums (padded rows contribute 0)
    acc_ref[0] = acc_ref[0] + jnp.sum(surrogate * valid)
    acc_ref[1] = acc_ref[1] + jnp.sum(l1 * valid)
    acc_ref[2] = acc_ref[2] + jnp.sum(ent_rows * valid)

    @pl.when(i == pl.num_programs(0) - 1)
    def _finalize():
        actor = -acc_ref[0] * inv_n
        critic = acc_ref[1] * inv_n
        entropy = -acc_ref[2] * inv_n
        out_ref[0] = actor + critic - c2 * entropy
        out_ref[1] = actor
        out_ref[2] = critic
        out_ref[3] = entropy


def ppo_loss(pack, new_log_probs, values, *, epsilon=EPSILON, c2=C2, tile_n=None):
    """Pallas TPU implementation of Loss.forward.

    pack: dict with 'ref_log_probs' (n,), 'actions' (n,) int, 'advantages' (n,),
          'V' (n,).  new_log_probs: (n, A) (f32 or bf16).  values: (n,).
    Returns device scalars (jit-friendly); no host syncs.
    """
    n, a = new_log_probs.shape

    # Pack per-sample vectors + validity mask into one lane-packed (n, 8) array.
    side = jnp.stack(
        [
            pack["actions"].astype(jnp.float32),
            pack["ref_log_probs"].astype(jnp.float32),
            pack["advantages"].astype(jnp.float32),
            pack["V"].astype(jnp.float32),
            values.astype(jnp.float32),
            jnp.ones((n,), jnp.float32),
        ],
        axis=1,
    )
    side = jnp.pad(side, ((0, 0), (0, 2)))      # (n, 8)

    # Tile size: largest multiple-of-8 row count giving a ~2 MiB nlp tile
    # (in its HBM dtype), capped at 2048 rows, never larger than round_up(n, 8).
    if tile_n is None:
        itemsize = jnp.dtype(new_log_probs.dtype).itemsize
        rows_for_budget = max(8, ((2 * 1024 * 1024) // max(a * itemsize, 1)) // 8 * 8)
        tile_n = min(2048, rows_for_budget)
    tn = max(8, _round_up(min(int(tile_n), _round_up(n, 8)), 8))
    n_pad = _round_up(n, tn)
    num_tiles = n_pad // tn

    nlp = new_log_probs
    if n_pad != n:
        nlp = jnp.pad(nlp, ((0, n_pad - n), (0, 0)))
        side = jnp.pad(side, ((0, n_pad - n), (0, 0)))

    # VMEM budget hint: double-buffered nlp tiles + (lane-padded) side tiles.
    nlp_tile_bytes = tn * a * nlp.dtype.itemsize
    side_tile_bytes = tn * 128 * 4                      # 8 -> 128 lane padding
    vmem_limit = int(min(48 * 1024 * 1024,
                         max(16 * 1024 * 1024,
                             4 * (nlp_tile_bytes + side_tile_bytes))))

    kernel = functools.partial(_ppo_loss_kernel,
                               epsilon=epsilon, c2=c2, inv_n=1.0 / n)

    out = pl.pallas_call(
        kernel,
        out_shape=jax.ShapeDtypeStruct((4,), jnp.float32),
        grid_spec=pltpu.PrefetchScalarGridSpec(
            num_scalar_prefetch=0,
            grid=(num_tiles,),
            in_specs=[
                pl.BlockSpec((tn, a), lambda i: (i, 0)),
                pl.BlockSpec((tn, 8), lambda i: (i, 0)),
            ],
            out_specs=pl.BlockSpec((4,), lambda i: (0,),
                                   memory_space=pltpu.MemorySpace.SMEM),
            scratch_shapes=[pltpu.SMEM((3,), jnp.float32)],
        ),
        compiler_params=pltpu.CompilerParams(
            dimension_semantics=("arbitrary",),
            vmem_limit_bytes=vmem_limit,
        ),
    )(nlp, side)

    return {
        "loss": out[0],
        "actor": out[1],
        "critic": out[2],
        "entropy": out[3],
        "steps": n,
    }


def _ref_loss(pack, new_log_probs, values, *, epsilon=EPSILON, c2=C2):
    """Pure-JAX reference mirroring the PyTorch forward."""
    n = pack["ref_log_probs"].shape[0]
    chosen = new_log_probs[jnp.arange(n), pack["actions"]]
    ratio = jnp.exp(chosen - pack["ref_log_probs"])
    adv = pack["advantages"]
    lb = jnp.where(adv < 0, 1.0 - epsilon, 0.0)
    ub = jnp.where(adv > 0, 1.0 + epsilon, 10000.0)
    actor = -jnp.mean(jnp.minimum(ratio * adv, jnp.clip(ratio, lb, ub) * adv))
    critic = jnp.mean(jnp.abs(values - pack["V"]))
    entropy = -jnp.mean(jnp.sum(jnp.exp(new_log_probs) * new_log_probs, axis=-1))
    return actor + critic - c2 * entropy, actor, critic, entropy


def _make_case(key, n, num_actions):
    k1, k2, k3, k4, k5, k6 = jax.random.split(key, 6)
    logits = jax.random.normal(k1, (n, num_actions), dtype=jnp.float32)
    new_log_probs = jax.nn.log_softmax(logits, axis=-1)
    actions = jax.random.randint(k2, (n,), 0, num_actions, dtype=jnp.int32)
    ref_logits = jax.random.normal(k3, (n, num_actions), dtype=jnp.float32)
    ref_log_probs = jax.nn.log_softmax(ref_logits, axis=-1)[jnp.arange(n), actions]
    advantages = jax.random.normal(k4, (n,), dtype=jnp.float32)
    v_target = jax.random.normal(k5, (n,), dtype=jnp.float32)
    values = jax.random.normal(k6, (n,), dtype=jnp.float32)
    pack = {"ref_log_probs": ref_log_probs, "actions": actions,
            "advantages": advantages, "V": v_target}
    return pack, new_log_probs, values


def _check(pack, new_log_probs, values, *, tile_n=None, atol=1e-4):
    out = ppo_loss(pack, new_log_probs, values, tile_n=tile_n)
    jax.block_until_ready(out["loss"])
    ref_total, ref_actor, ref_critic, ref_entropy = _ref_loss(
        pack, new_log_probs, values)
    assert abs(float(out["loss"]) - float(ref_total)) < atol, (out["loss"], ref_total)
    assert abs(float(out["actor"]) - float(ref_actor)) < atol
    assert abs(float(out["critic"]) - float(ref_critic)) < atol
    assert abs(float(out["entropy"]) - float(ref_entropy)) < atol
    assert out["steps"] == pack["ref_log_probs"].shape[0]


if __name__ == "__main__":
    key = jax.random.PRNGKey(0)
    k_a, k_b = jax.random.split(key)

    # Case 1: tiny shapes matching the module's typical usage (single tile).
    pack1, nlp1, vals1 = _make_case(k_a, n=8, num_actions=32)
    _check(pack1, nlp1, vals1)

    # Case 2: multi-tile grid with a partially-padded last tile (n=200, tn=64).
    pack2, nlp2, vals2 = _make_case(k_b, n=200, num_actions=128)
    _check(pack2, nlp2, vals2, tile_n=64)

    print("KERNEL_OK")
</pallas_src>

<mosaic_0001>
module attributes {stable_mosaic.version = 11 : i64} {
  func.func @_ppo_loss_kernel(%arg0: i32, %arg1: memref<8x32xf32, #tpu.memory_space<vmem>>, %arg2: memref<8x8xf32, #tpu.memory_space<vmem>>, %arg3: memref<4xf32, #tpu.memory_space<smem>>, %arg4: memref<3xf32, #tpu.memory_space<smem>>) attributes {dimension_semantics = [#tpu.dimension_semantics<arbitrary>], iteration_bounds = array<i64: 1>, scalar_prefetch = 0 : i64, scratch_operands = 1 : i64, tpu.core_type = #tpu.core_type<tc>, window_params = [{transform_indices = @transform_0, window_bounds = array<i64: 8, 32>}, {transform_indices = @transform_1, window_bounds = array<i64: 8, 8>}, {transform_indices = @transform_2, window_bounds = array<i64: 4>}]} {
    %c0_i32 = arith.constant 0 : i32
    %0 = arith.cmpi eq, %arg0, %c0_i32 : i32
    %1 = arith.extui %0 : i1 to i32
    %c0_i32_0 = arith.constant 0 : i32
    %2 = arith.cmpi ne, %1, %c0_i32_0 : i32
    scf.if %2 {
      %cst_21 = arith.constant 0.000000e+00 : f32
      %c0_22 = arith.constant 0 : index
      %70 = memref.load %arg4[%c0_22] : memref<3xf32, #tpu.memory_space<smem>>
      memref.store %cst_21, %arg4[%c0_22] : memref<3xf32, #tpu.memory_space<smem>>
      %cst_23 = arith.constant 0.000000e+00 : f32
      %c1_24 = arith.constant 1 : index
      %71 = memref.load %arg4[%c1_24] : memref<3xf32, #tpu.memory_space<smem>>
      memref.store %cst_23, %arg4[%c1_24] : memref<3xf32, #tpu.memory_space<smem>>
      %cst_25 = arith.constant 0.000000e+00 : f32
      %c2_26 = arith.constant 2 : index
      %72 = memref.load %arg4[%c2_26] : memref<3xf32, #tpu.memory_space<smem>>
      memref.store %cst_25, %arg4[%c2_26] : memref<3xf32, #tpu.memory_space<smem>>
    } else {
    }
    %c0 = arith.constant 0 : index
    %c0_1 = arith.constant 0 : index
    %3 = vector.load %arg1[%c0, %c0_1] : memref<8x32xf32, #tpu.memory_space<vmem>>, vector<8x32xf32>
    %c0_2 = arith.constant 0 : index
    %c0_3 = arith.constant 0 : index
    %4 = vector.load %arg2[%c0_2, %c0_3] : memref<8x8xf32, #tpu.memory_space<vmem>>, vector<8x8xf32>
    %5 = vector.extract_strided_slice %4 {offsets = [0, 0], sizes = [8, 1], strides = [1, 1]} : vector<8x8xf32> to vector<8x1xf32>
    %6 = arith.fptosi %5 : vector<8x1xf32> to vector<8x1xi32>
    %7 = vector.extract_strided_slice %4 {offsets = [0, 1], sizes = [8, 1], strides = [1, 1]} : vector<8x8xf32> to vector<8x1xf32>
    %8 = vector.extract_strided_slice %4 {offsets = [0, 2], sizes = [8, 1], strides = [1, 1]} : vector<8x8xf32> to vector<8x1xf32>
    %9 = vector.extract_strided_slice %4 {offsets = [0, 3], sizes = [8, 1], strides = [1, 1]} : vector<8x8xf32> to vector<8x1xf32>
    %10 = vector.extract_strided_slice %4 {offsets = [0, 4], sizes = [8, 1], strides = [1, 1]} : vector<8x8xf32> to vector<8x1xf32>
    %11 = vector.extract_strided_slice %4 {offsets = [0, 5], sizes = [8, 1], strides = [1, 1]} : vector<8x8xf32> to vector<8x1xf32>
    %12 = tpu.iota {dimensions = array<i32: 1>} : vector<1x32xi32>
    %13 = vector.broadcast %12 : vector<1x32xi32> to vector<8x32xi32>
    %14 = vector.broadcast %6 : vector<8x1xi32> to vector<8x32xi32>
    %15 = arith.cmpi eq, %13, %14 : vector<8x32xi32>
    %cst = arith.constant 0.000000e+00 : f32
    %16 = vector.broadcast %cst : f32 to vector<8x32xf32>
    %17 = arith.select %15, %3, %16 : vector<8x32xi1>, vector<8x32xf32>
    %cst_4 = arith.constant dense<0.000000e+00> : vector<8xf32>
    %18 = vector.multi_reduction <add>, %17, %cst_4 [1] : vector<8x32xf32> to vector<8xf32>
    %19 = vector.shape_cast %18 : vector<8xf32> to vector<8x1xf32>
    %20 = arith.subf %19, %7 : vector<8x1xf32>
    %21 = math.exp %20 : vector<8x1xf32>
    %cst_5 = arith.constant 0.000000e+00 : f32
    %22 = vector.broadcast %cst_5 : f32 to vector<8x1xf32>
    %23 = arith.cmpf olt, %8, %22 : vector<8x1xf32>
    %cst_6 = arith.constant 8.000000e-01 : f32
    %cst_7 = arith.constant 0.000000e+00 : f32
    %24 = vector.broadcast %cst_6 : f32 to vector<8x1xf32>
    %25 = vector.broadcast %cst_7 : f32 to vector<8x1xf32>
    %26 = arith.select %23, %24, %25 : vector<8x1xi1>, vector<8x1xf32>
    %cst_8 = arith.constant 0.000000e+00 : f32
    %27 = vector.broadcast %cst_8 : f32 to vector<8x1xf32>
    %28 = arith.cmpf ogt, %8, %27 : vector<8x1xf32>
    %cst_9 = arith.constant 1.200000e+00 : f32
    %cst_10 = arith.constant 1.000000e+04 : f32
    %29 = vector.broadcast %cst_9 : f32 to vector<8x1xf32>
    %30 = vector.broadcast %cst_10 : f32 to vector<8x1xf32>
    %31 = arith.select %28, %29, %30 : vector<8x1xi1>, vector<8x1xf32>
    %32 = arith.mulf %21, %8 : vector<8x1xf32>
    %33 = arith.maximumf %26, %21 : vector<8x1xf32>
    %34 = arith.minimumf %31, %33 : vector<8x1xf32>
    %35 = arith.mulf %34, %8 : vector<8x1xf32>
    %36 = arith.minimumf %32, %35 : vector<8x1xf32>
    %37 = arith.subf %10, %9 : vector<8x1xf32>
    %38 = math.absf %37 : vector<8x1xf32>
    %39 = math.exp %3 : vector<8x32xf32>
    %40 = arith.mulf %39, %3 : vector<8x32xf32>
    %cst_11 = arith.constant dense<0.000000e+00> : vector<8xf32>
    %41 = vector.multi_reduction <add>, %40, %cst_11 [1] : vector<8x32xf32> to vector<8xf32>
    %42 = vector.shape_cast %41 : vector<8xf32> to vector<8x1xf32>
    %c0_12 = arith.constant 0 : index
    %43 = memref.load %arg4[%c0_12] : memref<3xf32, #tpu.memory_space<smem>>
    %44 = arith.mulf %36, %11 : vector<8x1xf32>
    %45 = vector.shape_cast %44 : vector<8x1xf32> to vector<1x8x1xf32>
    %cst_13 = arith.constant dense<0.000000e+00> : vector<1xf32>
    %46 = vector.multi_reduction <add>, %45, %cst_13 [1, 2] : vector<1x8x1xf32> to vector<1xf32>
    %47 = vector.shape_cast %46 : vector<1xf32> to vector<1x1x1xf32>
    %48 = vector.extract %47[0, 0, 0] : f32 from vector<1x1x1xf32>
    %49 = arith.addf %43, %48 : f32
    %c0_14 = arith.constant 0 : index
    %50 = memref.load %arg4[%c0_14] : memref<3xf32, #tpu.memory_space<smem>>
    memref.store %49, %arg4[%c0_14] : memref<3xf32, #tpu.memory_space<smem>>
    %c1 = arith.constant 1 : index
    %51 = memref.load %arg4[%c1] : memref<3xf32, #tpu.memory_space<smem>>
    %52 = arith.mulf %38, %11 : vector<8x1xf32>
    %53 = vector.shape_cast %52 : vector<8x1xf32> to vector<1x8x1xf32>
    %cst_15 = arith.constant dense<0.000000e+00> : vector<1xf32>
    %54 = vector.multi_reduction <add>, %53, %cst_15 [1, 2] : vector<1x8x1xf32> to vector<1xf32>
    %55 = vector.shape_cast %54 : vector<1xf32> to vector<1x1x1xf32>
    %56 = vector.extract %55[0, 0, 0] : f32 from vector<1x1x1xf32>
    %57 = arith.addf %51, %56 : f32
    %c1_16 = arith.constant 1 : index
    %58 = memref.load %arg4[%c1_16] : memref<3xf32, #tpu.memory_space<smem>>
    memref.store %57, %arg4[%c1_16] : memref<3xf32, #tpu.memory_space<smem>>
    %c2 = arith.constant 2 : index
    %59 = memref.load %arg4[%c2] : memref<3xf32, #tpu.memory_space<smem>>
    %60 = arith.mulf %42, %11 : vector<8x1xf32>
    %61 = vector.shape_cast %60 : vector<8x1xf32> to vector<1x8x1xf32>
    %cst_17 = arith.constant dense<0.000000e+00> : vector<1xf32>
    %62 = vector.multi_reduction <add>, %61, %cst_17 [1, 2] : vector<1x8x1xf32> to vector<1xf32>
    %63 = vector.shape_cast %62 : vector<1xf32> to vector<1x1x1xf32>
    %64 = vector.extract %63[0, 0, 0] : f32 from vector<1x1x1xf32>
    %65 = arith.addf %59, %64 : f32
    %c2_18 = arith.constant 2 : index
    %66 = memref.load %arg4[%c2_18] : memref<3xf32, #tpu.memory_space<smem>>
    memref.store %65, %arg4[%c2_18] : memref<3xf32, #tpu.memory_space<smem>>
    %c0_i32_19 = arith.constant 0 : i32
    %67 = arith.cmpi eq, %arg0, %c0_i32_19 : i32
    %68 = arith.extui %67 : i1 to i32
    %c0_i32_20 = arith.constant 0 : i32
    %69 = arith.cmpi ne, %68, %c0_i32_20 : i32
    scf.if %69 {
      %c0_21 = arith.constant 0 : index
      %70 = memref.load %arg4[%c0_21] : memref<3xf32, #tpu.memory_space<smem>>
      %cst_22 = arith.constant 0.000000e+00 : f32
      %71 = arith.subf %cst_22, %70 : f32
      %cst_23 = arith.constant 1.250000e-01 : f32
      %72 = arith.mulf %71, %cst_23 : f32
      %c1_24 = arith.constant 1 : index
      %73 = memref.load %arg4[%c1_24] : memref<3xf32, #tpu.memory_space<smem>>
      %cst_25 = arith.constant 1.250000e-01 : f32
      %74 = arith.mulf %73, %cst_25 : f32
      %c2_26 = arith.constant 2 : index
      %75 = memref.load %arg4[%c2_26] : memref<3xf32, #tpu.memory_space<smem>>
      %cst_27 = arith.constant 0.000000e+00 : f32
      %76 = arith.subf %cst_27, %75 : f32
      %cst_28 = arith.constant 1.250000e-01 : f32
      %77 = arith.mulf %76, %cst_28 : f32
      %78 = arith.addf %72, %74 : f32
      %cst_29 = arith.constant 1.000000e-01 : f32
      %79 = arith.mulf %cst_29, %77 : f32
      %80 = arith.subf %78, %79 : f32
      %c0_30 = arith.constant 0 : index
      %81 = memref.load %arg3[%c0_30] : memref<4xf32, #tpu.memory_space<smem>>
      memref.store %80, %arg3[%c0_30] : memref<4xf32, #tpu.memory_space<smem>>
      %c1_31 = arith.constant 1 : index
      %82 = memref.load %arg3[%c1_31] : memref<4xf32, #tpu.memory_space<smem>>
      memref.store %72, %arg3[%c1_31] : memref<4xf32, #tpu.memory_space<smem>>
      %c2_32 = arith.constant 2 : index
      %83 = memref.load %arg3[%c2_32] : memref<4xf32, #tpu.memory_space<smem>>
      memref.store %74, %arg3[%c2_32] : memref<4xf32, #tpu.memory_space<smem>>
      %c3 = arith.constant 3 : index
      %84 = memref.load %arg3[%c3] : memref<4xf32, #tpu.memory_space<smem>>
      memref.store %77, %arg3[%c3] : memref<4xf32, #tpu.memory_space<smem>>
    } else {
    }
    return
  }
  func.func @transform_0(%arg0: i32) -> (i32, i32) {
    %c0_i32 = arith.constant 0 : i32
    %c0_i32_0 = arith.constant 0 : i32
    return %arg0, %c0_i32 : i32, i32
  }
  func.func @transform_1(%arg0: i32) -> (i32, i32) {
    %c0_i32 = arith.constant 0 : i32
    %c0_i32_0 = arith.constant 0 : i32
    return %arg0, %c0_i32 : i32, i32
  }
  func.func @transform_2(%arg0: i32) -> i32 {
    %c0_i32 = arith.constant 0 : i32
    %c0_i32_0 = arith.constant 0 : i32
    return %c0_i32 : i32
  }
}

</mosaic_0001>

<bundles_post_ra>
// kernel: tpu_custom_call.1
= control target key start
LH: loop header
LB: loop body
LE: loop exit
PB: predicated region body
PF: predicated region fallthrough
CT: control target
= control target key end

     0   :  { %7 = vsyncpa [#allocation4], 0  ;;  %s313_s0 = inlined_call_operand.hbm [shape: f32[8,32], index: 0, kind: input, shape index: {}]   ;;  %s314_s1 = inlined_call_operand.hbm [shape: f32[8,8], index: 1, kind: input, shape index: {}]   ;;  %s315_s2 = inlined_call_operand.hbm [shape: f32[4], index: 2, kind: output, shape index: {}]  }
   0x1   :  { %8 = vsyncpa [#allocation7], 0 }
   0x2   :  { %9 = vsyncpa [#allocation5], 0  ;;  %s274_s9 = smov [#allocation3]   ;;  %s275_s11 = smov [#allocation6]  }
   0x3   :  { %s16_s10 = sshll.u32 %s274_s9, 4  ;;  %s26_s12 = sshll.u32 %s275_s11, 4  ;;  %s17_s10 = int_to_ptr.vmem [resolvable:$true] %s16_s10  ;;  %s27_s12 = int_to_ptr.vmem [resolvable:$true] %s26_s12 }
   0x4   :  { %s228_s13 = scalar_lea.vmem %s17_s10, 128  ;;  %p233_p1 = scmp.lt.s32.totalorder %s17_s10, %s17_s10 }
   0x5   :  { %p229_p0 = scmp.ne.s32.totalorder %s17_s10, %s228_s13  ;;  %p234_p2 = scmp.lt.s32.totalorder %s228_s13, %s228_s13 }
   0x7   :  { %p235_p3 = por %p234_p2, %p233_p1 }
   0x9   :  { %p236_p4 = pnand %p235_p3, %p229_p0 }
   0xb   :  { %239 = shalt.err (!%p236_p4)
}
   0xc   :  { %19 = dma.hbm_to_vmem [thread:$0]  %s313_s0, 128, %s17_s10, [#allocation4]  }
   0xd   :  { %s248_s16 = scalar_lea.vmem %s27_s12, 128  ;;  %p253_p6 = scmp.lt.s32.totalorder %s27_s12, %s27_s12 }
   0xe   :  { %p249_p5 = scmp.ne.s32.totalorder %s27_s12, %s248_s16  ;;  %p254_p7 = scmp.lt.s32.totalorder %s248_s16, %s248_s16 }
  0x10   :  { %p255_p8 = por %p254_p7, %p253_p6 }
  0x12   :  { %p256_p9 = pnand %p255_p8, %p249_p5 }
  0x14   :  { %259 = shalt.err (!%p256_p9)
}
  0x15   :  { %29 = dma.hbm_to_vmem [thread:$0]  %s314_s1, 128, %s27_s12, [#allocation7]  }
  0x16   :  { %268 = dma.done.wait [#allocation4], 128  }
  0x17   :  { %269 = vsyncadd [#allocation4], 4294967168 }
  0x18   :  { %270 = dma.done.wait [#allocation7], 128  }
  0x19   :  { %271 = vsyncadd [#allocation7], 4294967168  ;;  %v276_v0 = vmov 0   ;;  %v47_v1 = vld [vmem:[#allocation6] sm:$0xff]  ;;  %v49_v4 = vlaneseq  ;;  %v46_v6 = vld [vmem:[#allocation3] sm:$0xff]  ;;  %vm56_vm0 = vcmask 261120  }
  0x1a   :  { %215 = vset.pattern.permute.xlu0 %v276_v0  ;;  %v197_v2 = vtrunc.f32 %v47_v1  ;;  %s277_s0 = smov 127   ;;  %s278_s1 = smov 1   ;;  %v89_v14 = vmul.f32 1.442695, %v46_v6  ;;  %vm63_vm2 = vcmp.lt.f32.partialorder %v47_v1, 0.0  ;;  %vm65_vm3 = vcmp.gt.f32.partialorder %v47_v1, 0.0 }
  0x1b   :  { %v50_v5 = vand.u32 127, %v49_v4  ;;  %s279_s19 = smov 124   ;;  %v280_v18 = vmov 0.0   ;;  %v281_v20 = vmov 10000.0   ;;  %s282_s20 = smov 123   ;;  %vm104_vm4 = vcmask 7168  }
  0x1c   :  { %v198_v3 = vcvt.f32.s32 %v197_v2  ;;  %v64_v19 = vsel %vm63_vm2, 0.8, %v280_v18  ;;  %v66_v21 = vsel %vm65_vm3, 1.2, %v281_v20  ;;  %s283_s4 = smov [#allocation8]  }
  0x1e   :  { %52 = vperm.xlu0 %215, %v198_v3  }
  0x99   :  { %v53_v7 = vpop.permute.xlu0 %52 }
  0x9a   :  { %vm54_vm1 = vcmp.eq.s32.totalorder %v50_v5, %v53_v7 }
  0x9b   :  { %v55_v8 = vsel %vm54_vm1, %v46_v6, 0.0 }
  0x9c   :  { %v57_v9 = vsel %vm56_vm0, %v55_v8, 0.0 }
  0x9d   :  { %58 = vadd.xlane.f32.xlu0 %v57_v9 }
  0xb3   :  { %68 = vrot.lane.b32.xlu0 %v47_v1, %s277_s0 }
 0x126   :  { %v59_v10 = vpop.xlane.xlu0 %58 }
 0x127   :  { %v60_v11 = vsub.f32 %v59_v10, %v47_v1 }
 0x129   :  { %v61_v12 = vmul.f32 1.442695, %v60_v11 }
 0x12a   :  { %v69_v30 = vpop.permute.xlu0 %68 }
 0x12b   :  { %216 = vpow2.f32 %v61_v12 }
 0x12c   :  { %218 = vpow2.f32 %v89_v14 }
 0x138   :  { %v217_v13 = vpop.eup %216 }
 0x139   :  { %73 = vrot.lane.b32.xlu1 %v217_v13, %s278_s1  ;;  %v219_v15 = vpop.eup %218  ;;  %v71_v32 = vmul.f32 %v217_v13, %v69_v30 }
 0x13a   :  { %v91_v16 = vmul.f32 %v219_v15, %v46_v6 }
 0x13c   :  { %v92_v17 = vsel %vm56_vm0, %v91_v16, 0.0 }
 0x15d   :  { %93 = vadd.xlane.f32.xlu1 %v92_v17 }
 0x16e   :  { %84 = vrot.lane.b32.xlu1 %v47_v1, %s278_s1 }
 0x172   :  { %96 = vrot.lane.b32.xlu1 %v47_v1, %s279_s19 }
 0x1ab   :  { %v74_v22 = vpop.permute.xlu1 %73 }
 0x1ac   :  { %v76_v23 = vmax.f32 %v64_v19, %v74_v22 }
 0x1ae   :  { %v77_v24 = vmin.f32 %v66_v21, %v76_v23 }
 0x1b0   :  { %v78_v25 = vmul.f32 %v77_v24, %v47_v1 }
 0x1b2   :  { %80 = vrot.lane.b32.xlu0 %v78_v25, %s277_s0 }
 0x1e6   :  { %v94_v26 = vpop.xlane.xlu1 %93 }
 0x1e7   :  { %v138_v37 = vmul.f32 %v94_v26, %v47_v1 }
 0x1ea   :  { %v85_v27 = vpop.permute.xlu1 %84 }
 0x1eb   :  { %v87_v28 = vsub.f32 %v47_v1, %v85_v27 }
 0x1ed   :  { %v88_v29 = vand.u32 2147483647, %v87_v28 }
 0x1ee   :  { %v97_v34 = vpop.permute.xlu1 %96 }
 0x1ef   :  { %v119_v31 = vmul.f32 %v88_v29, %v69_v30 }
 0x1f1   :  { %121 = vrot.lane.b32.xlu1 %v119_v31, %s279_s19 }
 0x224   :  { %v81_v33 = vpop.permute.xlu0 %80 }
 0x225   :  { %v83_v35 = vmin.f32 %v71_v32, %v81_v33 }
 0x227   :  { %v99_v36 = vmul.f32 %v97_v34, %v83_v35 }
 0x229   :  { %101 = vrot.lane.b32.xlu0 %v99_v36, %s277_s0 }
 0x22d   :  { %140 = vrot.lane.b32.xlu0 %v138_v37, %s282_s20 }
 0x263   :  { %v122_v38 = vpop.permute.xlu1 %121 }
 0x264   :  { %v124_v39 = vsel %vm104_vm4, %v122_v38, 0.0 }
 0x265   :  { %125 = vadd.xlane.f32.xlu0 %v124_v39 }
 0x29b   :  { %v102_v40 = vpop.permute.xlu0 %101 }
 0x29c   :  { %v105_v41 = vsel %vm104_vm4, %v102_v40, 0.0 }
 0x29d   :  { %106 = vadd.xlane.f32.xlu1 %v105_v41 }
 0x29f   :  { %v141_v42 = vpop.permute.xlu0 %140 }
 0x2a0   :  { %v143_v43 = vsel %vm104_vm4, %v141_v42, 0.0 }
 0x2a1   :  { %144 = vadd.xlane.f32.xlu0 %v143_v43 }
 0x2ee   :  { %v126_v44 = vpop.xlane.xlu0 %125 }
 0x2ef   :  { %v127_v45 = vrot.slane %v126_v44, 4 }
 0x2f1   :  { %v128_v46 = vadd.f32 %v127_v45, %v126_v44 }
 0x2f3   :  { %v129_v47 = vrot.slane %v128_v46, 2 }
 0x2f5   :  { %v130_v52 = vadd.f32 %v129_v47, %v128_v46 }
 0x2f7   :  { %v131_v57 = vrot.slane %v130_v52, 1 }
 0x2f9   :  { %v132_v62 = vadd.f32 %v131_v57, %v130_v52 }
 0x326   :  { %v107_v48 = vpop.xlane.xlu1 %106 }
 0x327   :  { %v108_v49 = vrot.slane %v107_v48, 4 }
 0x329   :  { %v109_v50 = vadd.f32 %v108_v49, %v107_v48 }
 0x32a   :  { %v145_v51 = vpop.xlane.xlu0 %144 }
 0x32b   :  { %v110_v53 = vrot.slane %v109_v50, 2  ;;  %v146_v54 = vrot.slane %v145_v51, 4 }
 0x32d   :  { %v147_v55 = vadd.f32 %v146_v54, %v145_v51  ;;  %v111_v56 = vadd.f32 %v110_v53, %v109_v50 }
 0x32f   :  { %v148_v58 = vrot.slane %v147_v55, 2  ;;  %v112_v59 = vrot.slane %v111_v56, 1 }
 0x331   :  { %v149_v60 = vadd.f32 %v148_v58, %v147_v55  ;;  %v113_v61 = vadd.f32 %v112_v59, %v111_v56 }
 0x333   :  { %199 = vpush %v113_v61  ;;  %v150_v63 = vrot.slane %v149_v60, 1 }
 0x334   :  { %201 = vpush %v132_v62 }
 0x335   :  { %v151_v0 = vadd.f32 %v150_v63, %v149_v60 }
 0x337   :  { %203 = vpush %v151_v0 }
 0x364   :  { %s200_s21 = spop %199 }
 0x365   :  { %s160_s22 = ssub.f32 0.0, %s200_s21  ;;  %s202_s23 = spop %201 }
 0x366   :  { %s163_s24 = smul.f32 0.125, %s202_s23 }
 0x367   :  { %s161_s25 = smul.f32 0.125, %s160_s22 }
 0x368   :  { %175 = sst [smem:[#allocation8 + $0x2]] %s163_s24  ;;  %s204_s26 = spop %203 }
 0x369   :  { %173 = sst [smem:[#allocation8 + $0x1]] %s161_s25 }
 0x36a   :  { %s165_s27 = ssub.f32 0.0, %s204_s26 }
 0x36b   :  { %s167_s29 = sadd.f32 %s163_s24, %s161_s25 }
 0x36c   :  { %s166_s28 = smul.f32 0.125, %s165_s27 }
 0x36e   :  { %s168_s30 = smul.f32 0.1, %s166_s28  ;;  %177 = sst [smem:[#allocation8 + $0x3]] %s166_s28 }
 0x370   :  { %s169_s3 = ssub.f32 %s167_s29, %s168_s30 }
 0x372   :  { %171 = sst [smem:[#allocation8]] %s169_s3 }
 0x373   :  { %185 = dma.smem_to_hbm %s283_s4, 16, %s315_s2, [#allocation5]  }
 0x374   :  { %272 = dma.done.wait [#allocation5], 16  }
 0x375   :  { %273 = vsyncadd [#allocation5], 4294967280 }
 0x376   :  { %189 = sfence }
 0x377   :  { %190 = vsyncpa [#allocation4], 1 }
 0x378   :  { %191 = vsyncpa [#allocation7], 1 }
 0x379   :  { %192 = vsyncpa [#allocation5], 1 }

</bundles_post_ra>
